<compile_context>
chip_gen: v6e
topology: v6e:2x2x1
jax: 0.10.0
libtpu: 0.0.40
codegen_flags: <defaults>
</compile_context>

<pallas_src>
import jax
import jax.numpy as jnp
from jax import lax
from jax.experimental import pallas as pl
from jax.experimental.pallas import tpu as pltpu

_SUB = 8      # sublanes per vreg
_LANE = 128   # lanes per vreg


def _round_up(x, m):
    return -(-x // m) * m


def _cdiv(a, b):
    return -(-a // b)


def _per_buffer_budget_bytes():
    """Per-input-buffer tile budget.

    v6e / v7x: ~4 MiB per buffer (2 inputs x 2 pipeline buffers = 16 MiB, well
    inside their 32 MiB scoped-VMEM default).
    v5e (and unknown chips): 2 MiB so 2x2 buffers fit the 16 MiB scoped-VMEM
    default without raising vmem_limit_bytes.
    """
    try:
        kind = jax.devices()[0].device_kind.lower()
    except Exception:
        kind = ""
    if "v6" in kind or "v7" in kind:
        return 4 * 1024 * 1024
    return 2 * 1024 * 1024


def _make_kernel(rows, tile_rows, nk_per):
    n_chunks = tile_rows // _SUB

    def kernel(p_ref, t_ref, inter_ref, pt_ref, acc_i, acc_pt):
        # p_ref/t_ref: (tile_rows, 128) native dtype (one contiguous DMA each)
        # inter_ref/pt_ref: (8, 128) f32 lane-dense outputs (scalar broadcast)
        # acc_i/acc_pt: (8, 128) f32 scratch, persistent across the k axis
        s = pl.program_id(1)
        k = pl.program_id(2)

        @pl.when(k == 0)
        def _init():
            acc_i[...] = jnp.zeros_like(acc_i)
            acc_pt[...] = jnp.zeros_like(acc_pt)

        # Logical tile index. It may point past the last real tile when the
        # feature axis is split for megacore balance; such tiles (and the
        # out-of-bounds rows of the genuine last tile) are masked to zero.
        g = s * nk_per + k
        valid = rows - g * tile_rows     # in-bounds rows in this logical tile

        def body_full(j, carry):
            ci, cpt = carry
            off = pl.multiple_of(j * _SUB, _SUB)
            pj = p_ref[pl.ds(off, _SUB), :].astype(jnp.float32)
            tj = t_ref[pl.ds(off, _SUB), :].astype(jnp.float32)
            return ci + pj * tj, cpt + (pj + tj)

        @pl.when(valid >= tile_rows)
        def _full_tile():
            ci, cpt = lax.fori_loop(
                0, n_chunks, body_full, (acc_i[...], acc_pt[...]),
                unroll=min(8, n_chunks))
            acc_i[...] = ci
            acc_pt[...] = cpt

        @pl.when(valid < tile_rows)
        def _tail_tile():
            # Pallas does not zero out-of-bounds input rows -> mask them.
            # jnp.where is a select, so garbage (even NaN/inf) cannot leak.
            row_id = lax.broadcasted_iota(jnp.int32, (_SUB, _LANE), 0)

            def body_masked(j, carry):
                ci, cpt = carry
                off = pl.multiple_of(j * _SUB, _SUB)
                m = (row_id + j * _SUB) < valid
                pj = jnp.where(m, p_ref[pl.ds(off, _SUB), :].astype(jnp.float32), 0.0)
                tj = jnp.where(m, t_ref[pl.ds(off, _SUB), :].astype(jnp.float32), 0.0)
                return ci + pj * tj, cpt + (pj + tj)

            ci, cpt = lax.fori_loop(
                0, n_chunks, body_masked, (acc_i[...], acc_pt[...]),
                unroll=min(8, n_chunks))
            acc_i[...] = ci
            acc_pt[...] = cpt

        @pl.when(k == nk_per - 1)
        def _finalize():
            # Cross-lane then cross-sublane reduction, once per (sample, split).
            inter = jnp.sum(jnp.sum(acc_i[...], axis=-1, keepdims=True),
                            axis=0, keepdims=True)           # (1, 1)
            spt = jnp.sum(jnp.sum(acc_pt[...], axis=-1, keepdims=True),
                          axis=0, keepdims=True)             # (1, 1)
            inter_ref[...] = jnp.broadcast_to(inter, (_SUB, _LANE))
            pt_ref[...] = jnp.broadcast_to(spt, (_SUB, _LANE))

    return kernel


def iou_loss(predict, target):
    """Pallas TPU soft-IoU loss: mean_b(1 - inter_b / union_b)."""
    assert predict.shape == target.shape
    B = predict.shape[0]
    F = 1
    for d in predict.shape[1:]:
        F *= d

    itemsize = max(predict.dtype.itemsize, target.dtype.itemsize)

    # Per-sample contiguous (rows, 128) layout: a free reshape (no HBM copy)
    # whenever F % 128 == 0, which covers typical C*H*W image shapes.
    rows = _cdiv(F, _LANE)

    def prep(x):
        x = x.reshape(B, F)
        if rows * _LANE != F:
            # TODO(synk): a manual-DMA path could avoid this one-off HBM copy
            # for F % 128 != 0; not worth the complexity for image shapes.
            x = jnp.pad(x, ((0, 0), (0, rows * _LANE - F)))
        return x.reshape(B, rows, _LANE)

    p = prep(predict)
    t = prep(target)

    # Balanced feature tiling: pick the tile count first, then the tile size,
    # so the last tile is never mostly out-of-bounds.
    budget = _per_buffer_budget_bytes()
    max_tile_rows = max(_SUB, (budget // (_LANE * itemsize)) // _SUB * _SUB)
    nk_total = _cdiv(rows, max_tile_rows)
    tile_rows = _round_up(_cdiv(rows, nk_total), _SUB)

    # Megacore balance (v7x): with a single sample the "parallel" batch axis
    # cannot be sharded across the 2 TensorCores, so split the feature range
    # and combine the per-split partial sums in the wrapper.
    split = 2 if (B == 1 and nk_total >= 2) else 1
    nk_per = _cdiv(nk_total, split)

    def in_map(b, s, k):
        g = s * nk_per + k
        # Clamp fully out-of-range logical tiles (possible only when the split
        # does not divide evenly); they are masked to zero inside the kernel.
        return (b, jnp.minimum(g, nk_total - 1), 0)

    kernel = _make_kernel(rows, tile_rows, nk_per)

    cost = pl.CostEstimate(
        flops=4 * B * F,
        transcendentals=0,
        bytes_accessed=B * F * (predict.dtype.itemsize + target.dtype.itemsize)
        + 2 * B * split * _SUB * _LANE * 4,
    )

    compiler_params = pltpu.CompilerParams(
        dimension_semantics=("parallel", "parallel", "arbitrary"),
        vmem_limit_bytes=(32 * 1024 * 1024 if budget > 2 * 1024 * 1024 else None),
    )

    inter, pt = pl.pallas_call(
        kernel,
        out_shape=(
            jax.ShapeDtypeStruct((B, split, _SUB, _LANE), jnp.float32),
            jax.ShapeDtypeStruct((B, split, _SUB, _LANE), jnp.float32),
        ),
        grid=(B, split, nk_per),
        in_specs=[
            pl.BlockSpec((None, tile_rows, _LANE), in_map),
            pl.BlockSpec((None, tile_rows, _LANE), in_map),
        ],
        out_specs=(
            pl.BlockSpec((None, None, _SUB, _LANE), lambda b, s, k: (b, s, 0, 0)),
            pl.BlockSpec((None, None, _SUB, _LANE), lambda b, s, k: (b, s, 0, 0)),
        ),
        scratch_shapes=[
            pltpu.VMEM((_SUB, _LANE), jnp.float32),
            pltpu.VMEM((_SUB, _LANE), jnp.float32),
        ],
        compiler_params=compiler_params,
        cost_estimate=cost,
    )(p, t)

    # Per-(sample, split) scalars are broadcast across their (8,128) block;
    # take [..., 0, 0], reduce over the tiny split axis and finish in XLA.
    inter_b = jnp.sum(inter[:, :, 0, 0], axis=1)           # (B,)
    pt_b = jnp.sum(pt[:, :, 0, 0], axis=1)                 # (B,) = sum_p + sum_t
    union_b = pt_b - inter_b
    # NOTE: matches PyTorch reference exactly (no epsilon); all-zero
    # pred+target yields NaN there too.
    return jnp.mean(1.0 - inter_b / union_b)


def _iou_loss_ref(predict, target):
    B = predict.shape[0]
    p = predict.reshape(B, -1).astype(jnp.float32)
    t = target.reshape(B, -1).astype(jnp.float32)
    inter = jnp.sum(p * t, axis=-1)
    union = jnp.sum(p, axis=-1) + jnp.sum(t, axis=-1) - inter
    return jnp.mean(1.0 - inter / union)


if __name__ == "__main__":
    key = jax.random.PRNGKey(0)
    k1, k2 = jax.random.split(key)

    B, C, H, W = 2, 4, 16, 16
    # predict: sigmoid-like probabilities; target: binary mask
    predict = jax.nn.sigmoid(jax.random.normal(k1, (B, C, H, W), dtype=jnp.float32))
    target = (jax.random.uniform(k2, (B, C, H, W)) > 0.5).astype(jnp.float32)

    loss = iou_loss(predict, target)
    jax.block_until_ready(loss)

    ref = _iou_loss_ref(predict, target)
    assert jnp.allclose(loss, ref, atol=1e-5, rtol=1e-5), (loss, ref)

    print("KERNEL_OK")
</pallas_src>

<mosaic_0001>
module attributes {stable_mosaic.version = 11 : i64} {
  func.func @kernel(%arg0: i32, %arg1: i32, %arg2: i32, %arg3: memref<1x8x128xf32, #tpu.memory_space<vmem>>, %arg4: memref<1x8x128xf32, #tpu.memory_space<vmem>>, %arg5: memref<1x1x8x128xf32, #tpu.memory_space<vmem>>, %arg6: memref<1x1x8x128xf32, #tpu.memory_space<vmem>>, %arg7: memref<8x128xf32, #tpu.memory_space<vmem>>, %arg8: memref<8x128xf32, #tpu.memory_space<vmem>>) attributes {dimension_semantics = [#tpu.dimension_semantics<parallel>, #tpu.dimension_semantics<parallel>, #tpu.dimension_semantics<arbitrary>], iteration_bounds = array<i64: 2, 1, 1>, scalar_prefetch = 0 : i64, scratch_operands = 2 : i64, tpu.core_type = #tpu.core_type<tc>, window_params = [{transform_indices = @transform_0, window_bounds = array<i64: 1, 8, 128>}, {transform_indices = @transform_1, window_bounds = array<i64: 1, 8, 128>}, {transform_indices = @transform_2, window_bounds = array<i64: 1, 1, 8, 128>}, {transform_indices = @transform_3, window_bounds = array<i64: 1, 1, 8, 128>}]} {
    %c0_i32 = arith.constant 0 : i32
    %0 = arith.cmpi eq, %arg2, %c0_i32 : i32
    %1 = arith.extui %0 : i1 to i32
    %c0_i32_0 = arith.constant 0 : i32
    %2 = arith.cmpi ne, %1, %c0_i32_0 : i32
    scf.if %2 {
      %cst = arith.constant 0.000000e+00 : f32
      %16 = vector.broadcast %cst : f32 to vector<8x128xf32>
      %c0 = arith.constant 0 : index
      %c0_8 = arith.constant 0 : index
      %17 = vector.load %arg7[%c0, %c0_8] : memref<8x128xf32, #tpu.memory_space<vmem>>, vector<8x128xf32>
      tpu.vector_store %arg7[%c0, %c0_8], %16 {strides = array<i32>} : memref<8x128xf32, #tpu.memory_space<vmem>>, vector<8x128xf32>,
      %cst_9 = arith.constant 0.000000e+00 : f32
      %18 = vector.broadcast %cst_9 : f32 to vector<8x128xf32>
      %c0_10 = arith.constant 0 : index
      %c0_11 = arith.constant 0 : index
      %19 = vector.load %arg8[%c0_10, %c0_11] : memref<8x128xf32, #tpu.memory_space<vmem>>, vector<8x128xf32>
      tpu.vector_store %arg8[%c0_10, %c0_11], %18 {strides = array<i32>} : memref<8x128xf32, #tpu.memory_space<vmem>>, vector<8x128xf32>,
    } else {
    }
    %c1_i32 = arith.constant 1 : i32
    %3 = arith.muli %arg1, %c1_i32 : i32
    %4 = arith.addi %3, %arg2 : i32
    %c8_i32 = arith.constant 8 : i32
    %5 = arith.muli %4, %c8_i32 : i32
    %c8_i32_1 = arith.constant 8 : i32
    %6 = arith.subi %c8_i32_1, %5 : i32
    %c8_i32_2 = arith.constant 8 : i32
    %7 = arith.cmpi sge, %6, %c8_i32_2 : i32
    %8 = arith.extui %7 : i1 to i32
    %c0_i32_3 = arith.constant 0 : i32
    %9 = arith.cmpi ne, %8, %c0_i32_3 : i32
    scf.if %9 {
      %c0 = arith.constant 0 : index
      %c0_8 = arith.constant 0 : index
      %16 = vector.load %arg7[%c0, %c0_8] : memref<8x128xf32, #tpu.memory_space<vmem>>, vector<8x128xf32>
      %c0_9 = arith.constant 0 : index
      %c0_10 = arith.constant 0 : index
      %17 = vector.load %arg8[%c0_9, %c0_10] : memref<8x128xf32, #tpu.memory_space<vmem>>, vector<8x128xf32>
      %c0_i32_11 = arith.constant 0 : i32
      %c8_i32_12 = arith.constant 8 : i32
      %18 = arith.muli %c0_i32_11, %c8_i32_12 : i32
      %19 = tpu.assume_multiple %18, 8 : i32
      %c0_13 = arith.constant 0 : index
      %20 = arith.index_cast %19 : i32 to index
      %c0_14 = arith.constant 0 : index
      %21 = vector.load %arg3[%c0_13, %20, %c0_14] : memref<1x8x128xf32, #tpu.memory_space<vmem>>, vector<1x8x128xf32>
      %22 = vector.shape_cast %21 : vector<1x8x128xf32> to vector<8x128xf32>
      %c0_15 = arith.constant 0 : index
      %23 = arith.index_cast %19 : i32 to index
      %c0_16 = arith.constant 0 : index
      %24 = vector.load %arg4[%c0_15, %23, %c0_16] : memref<1x8x128xf32, #tpu.memory_space<vmem>>, vector<1x8x128xf32>
      %25 = vector.shape_cast %24 : vector<1x8x128xf32> to vector<8x128xf32>
      %26 = arith.mulf %22, %25 : vector<8x128xf32>
      %27 = arith.addf %16, %26 : vector<8x128xf32>
      %28 = arith.addf %22, %25 : vector<8x128xf32>
      %29 = arith.addf %17, %28 : vector<8x128xf32>
      %c1_i32_17 = arith.constant 1 : i32
      %c0_18 = arith.constant 0 : index
      %c0_19 = arith.constant 0 : index
      %30 = vector.load %arg7[%c0_18, %c0_19] : memref<8x128xf32, #tpu.memory_space<vmem>>, vector<8x128xf32>
      tpu.vector_store %arg7[%c0_18, %c0_19], %27 {strides = array<i32>} : memref<8x128xf32, #tpu.memory_space<vmem>>, vector<8x128xf32>,
      %c0_20 = arith.constant 0 : index
      %c0_21 = arith.constant 0 : index
      %31 = vector.load %arg8[%c0_20, %c0_21] : memref<8x128xf32, #tpu.memory_space<vmem>>, vector<8x128xf32>
      tpu.vector_store %arg8[%c0_20, %c0_21], %29 {strides = array<i32>} : memref<8x128xf32, #tpu.memory_space<vmem>>, vector<8x128xf32>,
    } else {
    }
    %c8_i32_4 = arith.constant 8 : i32
    %10 = arith.cmpi slt, %6, %c8_i32_4 : i32
    %11 = arith.extui %10 : i1 to i32
    %c0_i32_5 = arith.constant 0 : i32
    %12 = arith.cmpi ne, %11, %c0_i32_5 : i32
    scf.if %12 {
      %16 = tpu.iota {dimensions = array<i32: 0>} : vector<8x128xi32>
      %c0 = arith.constant 0 : index
      %c0_8 = arith.constant 0 : index
      %17 = vector.load %arg7[%c0, %c0_8] : memref<8x128xf32, #tpu.memory_space<vmem>>, vector<8x128xf32>
      %c0_9 = arith.constant 0 : index
      %c0_10 = arith.constant 0 : index
      %18 = vector.load %arg8[%c0_9, %c0_10] : memref<8x128xf32, #tpu.memory_space<vmem>>, vector<8x128xf32>
      %c0_i32_11 = arith.constant 0 : i32
      %c8_i32_12 = arith.constant 8 : i32
      %19 = arith.muli %c0_i32_11, %c8_i32_12 : i32
      %20 = tpu.assume_multiple %19, 8 : i32
      %c8_i32_13 = arith.constant 8 : i32
      %21 = arith.muli %c0_i32_11, %c8_i32_13 : i32
      %22 = vector.broadcast %21 : i32 to vector<8x128xi32>
      %23 = arith.addi %16, %22 : vector<8x128xi32>
      %24 = vector.broadcast %6 : i32 to vector<8x128xi32>
      %25 = arith.cmpi slt, %23, %24 : vector<8x128xi32>
      %c0_14 = arith.constant 0 : index
      %26 = arith.index_cast %20 : i32 to index
      %c0_15 = arith.constant 0 : index
      %27 = vector.load %arg3[%c0_14, %26, %c0_15] : memref<1x8x128xf32, #tpu.memory_space<vmem>>, vector<1x8x128xf32>
      %28 = vector.shape_cast %27 : vector<1x8x128xf32> to vector<8x128xf32>
      %cst = arith.constant 0.000000e+00 : f32
      %29 = vector.broadcast %cst : f32 to vector<8x128xf32>
      %30 = arith.select %25, %28, %29 : vector<8x128xi1>, vector<8x128xf32>
      %c0_16 = arith.constant 0 : index
      %31 = arith.index_cast %20 : i32 to index
      %c0_17 = arith.constant 0 : index
      %32 = vector.load %arg4[%c0_16, %31, %c0_17] : memref<1x8x128xf32, #tpu.memory_space<vmem>>, vector<1x8x128xf32>
      %33 = vector.shape_cast %32 : vector<1x8x128xf32> to vector<8x128xf32>
      %cst_18 = arith.constant 0.000000e+00 : f32
      %34 = vector.broadcast %cst_18 : f32 to vector<8x128xf32>
      %35 = arith.select %25, %33, %34 : vector<8x128xi1>, vector<8x128xf32>
      %36 = arith.mulf %30, %35 : vector<8x128xf32>
      %37 = arith.addf %17, %36 : vector<8x128xf32>
      %38 = arith.addf %30, %35 : vector<8x128xf32>
      %39 = arith.addf %18, %38 : vector<8x128xf32>
      %c1_i32_19 = arith.constant 1 : i32
      %c0_20 = arith.constant 0 : index
      %c0_21 = arith.constant 0 : index
      %40 = vector.load %arg7[%c0_20, %c0_21] : memref<8x128xf32, #tpu.memory_space<vmem>>, vector<8x128xf32>
      tpu.vector_store %arg7[%c0_20, %c0_21], %37 {strides = array<i32>} : memref<8x128xf32, #tpu.memory_space<vmem>>, vector<8x128xf32>,
      %c0_22 = arith.constant 0 : index
      %c0_23 = arith.constant 0 : index
      %41 = vector.load %arg8[%c0_22, %c0_23] : memref<8x128xf32, #tpu.memory_space<vmem>>, vector<8x128xf32>
      tpu.vector_store %arg8[%c0_22, %c0_23], %39 {strides = array<i32>} : memref<8x128xf32, #tpu.memory_space<vmem>>, vector<8x128xf32>,
    } else {
    }
    %c0_i32_6 = arith.constant 0 : i32
    %13 = arith.cmpi eq, %arg2, %c0_i32_6 : i32
    %14 = arith.extui %13 : i1 to i32
    %c0_i32_7 = arith.constant 0 : i32
    %15 = arith.cmpi ne, %14, %c0_i32_7 : i32
    scf.if %15 {
      %c0 = arith.constant 0 : index
      %c0_8 = arith.constant 0 : index
      %16 = vector.load %arg7[%c0, %c0_8] : memref<8x128xf32, #tpu.memory_space<vmem>>, vector<8x128xf32>
      %cst = arith.constant dense<0.000000e+00> : vector<8xf32>
      %17 = vector.multi_reduction <add>, %16, %cst [1] : vector<8x128xf32> to vector<8xf32>
      %18 = vector.shape_cast %17 : vector<8xf32> to vector<8x1xf32>
      %cst_9 = arith.constant dense<0.000000e+00> : vector<1xf32>
      %19 = vector.multi_reduction <add>, %18, %cst_9 [0] : vector<8x1xf32> to vector<1xf32>
      %20 = vector.shape_cast %19 : vector<1xf32> to vector<1x1xf32>
      %c0_10 = arith.constant 0 : index
      %c0_11 = arith.constant 0 : index
      %21 = vector.load %arg8[%c0_10, %c0_11] : memref<8x128xf32, #tpu.memory_space<vmem>>, vector<8x128xf32>
      %cst_12 = arith.constant dense<0.000000e+00> : vector<8xf32>
      %22 = vector.multi_reduction <add>, %21, %cst_12 [1] : vector<8x128xf32> to vector<8xf32>
      %23 = vector.shape_cast %22 : vector<8xf32> to vector<8x1xf32>
      %cst_13 = arith.constant dense<0.000000e+00> : vector<1xf32>
      %24 = vector.multi_reduction <add>, %23, %cst_13 [0] : vector<8x1xf32> to vector<1xf32>
      %25 = vector.shape_cast %24 : vector<1xf32> to vector<1x1xf32>
      %26 = vector.shape_cast %20 : vector<1x1xf32> to vector<1x1xf32>
      %27 = vector.broadcast %26 : vector<1x1xf32> to vector<8x128xf32>
      %c0_14 = arith.constant 0 : index
      %c0_15 = arith.constant 0 : index
      %c0_16 = arith.constant 0 : index
      %c0_17 = arith.constant 0 : index
      %28 = vector.load %arg5[%c0_14, %c0_15, %c0_16, %c0_17] : memref<1x1x8x128xf32, #tpu.memory_space<vmem>>, vector<1x1x8x128xf32>
      %29 = vector.shape_cast %28 : vector<1x1x8x128xf32> to vector<8x128xf32>
      %30 = vector.shape_cast %27 : vector<8x128xf32> to vector<1x1x8x128xf32>
      tpu.vector_store %arg5[%c0_14, %c0_15, %c0_16, %c0_17], %30 {strides = array<i32>} : memref<1x1x8x128xf32, #tpu.memory_space<vmem>>, vector<1x1x8x128xf32>,
      %31 = vector.shape_cast %25 : vector<1x1xf32> to vector<1x1xf32>
      %32 = vector.broadcast %31 : vector<1x1xf32> to vector<8x128xf32>
      %c0_18 = arith.constant 0 : index
      %c0_19 = arith.constant 0 : index
      %c0_20 = arith.constant 0 : index
      %c0_21 = arith.constant 0 : index
      %33 = vector.load %arg6[%c0_18, %c0_19, %c0_20, %c0_21] : memref<1x1x8x128xf32, #tpu.memory_space<vmem>>, vector<1x1x8x128xf32>
      %34 = vector.shape_cast %33 : vector<1x1x8x128xf32> to vector<8x128xf32>
      %35 = vector.shape_cast %32 : vector<8x128xf32> to vector<1x1x8x128xf32>
      tpu.vector_store %arg6[%c0_18, %c0_19, %c0_20, %c0_21], %35 {strides = array<i32>} : memref<1x1x8x128xf32, #tpu.memory_space<vmem>>, vector<1x1x8x128xf32>,
    } else {
    }
    return
  }
  func.func @transform_0(%arg0: i32, %arg1: i32, %arg2: i32) -> (i32, i32, i32) {
    %c1_i32 = arith.constant 1 : i32
    %0 = arith.muli %arg1, %c1_i32 : i32
    %1 = arith.addi %0, %arg2 : i32
    %c0_i32 = arith.constant 0 : i32
    %2 = arith.minsi %1, %c0_i32 : i32
    %c0_i32_0 = arith.constant 0 : i32
    %c0_i32_1 = arith.constant 0 : i32
    return %arg0, %2, %c0_i32_0 : i32, i32, i32
  }
  func.func @transform_1(%arg0: i32, %arg1: i32, %arg2: i32) -> (i32, i32, i32) {
    %c1_i32 = arith.constant 1 : i32
    %0 = arith.muli %arg1, %c1_i32 : i32
    %1 = arith.addi %0, %arg2 : i32
    %c0_i32 = arith.constant 0 : i32
    %2 = arith.minsi %1, %c0_i32 : i32
    %c0_i32_0 = arith.constant 0 : i32
    %c0_i32_1 = arith.constant 0 : i32
    return %arg0, %2, %c0_i32_0 : i32, i32, i32
  }
  func.func @transform_2(%arg0: i32, %arg1: i32, %arg2: i32) -> (i32, i32, i32, i32) {
    %c0_i32 = arith.constant 0 : i32
    %c0_i32_0 = arith.constant 0 : i32
    %c0_i32_1 = arith.constant 0 : i32
    return %arg0, %arg1, %c0_i32, %c0_i32_0 : i32, i32, i32, i32
  }
  func.func @transform_3(%arg0: i32, %arg1: i32, %arg2: i32) -> (i32, i32, i32, i32) {
    %c0_i32 = arith.constant 0 : i32
    %c0_i32_0 = arith.constant 0 : i32
    %c0_i32_1 = arith.constant 0 : i32
    return %arg0, %arg1, %c0_i32, %c0_i32_0 : i32, i32, i32, i32
  }
}

</mosaic_0001>

<bundles_post_ra>
// kernel: tpu_custom_call.1
= control target key start
LH: loop header
LB: loop body
LE: loop exit
PB: predicated region body
PF: predicated region fallthrough
CT: control target
= control target key end

     0   :  { %9 = vsyncpa [#allocation5], 0  ;;  %s1020_s0 = inlined_call_operand.hbm [shape: f32[2,8,128], index: 0, kind: input, shape index: {}]   ;;  %s1021_s1 = inlined_call_operand.hbm [shape: f32[2,8,128], index: 1, kind: input, shape index: {}]   ;;  %s1022_s2 = inlined_call_operand.hbm [shape: f32[2,1,8,128], index: 2, kind: output, shape index: {0}]   ;;  %s1023_s3 = inlined_call_operand.hbm [shape: f32[2,1,8,128], index: 3, kind: output, shape index: {1}]  }
   0x1   :  { %11 = vsyncpa [#allocation5 + $0x1], 0 }
   0x2   :  { %12 = vsyncpa [#allocation8], 0 }
   0x3   :  { %14 = vsyncpa [#allocation8 + $0x1], 0 }
   0x4   :  { %15 = vsyncpa [#allocation6], 0 }
   0x5   :  { %17 = vsyncpa [#allocation6 + $0x1], 0 }
   0x6   :  { %18 = vsyncpa [#allocation11], 0 }
   0x7   :  { %20 = vsyncpa [#allocation11 + $0x1], 0  ;;  %s814_s12 = smov 0   ;;  %s816_s13 = smov 0  }
   0x8   :  { %s818_s14 = smov 0   ;;  %s820_s15 = smov 0  }
   0x9   :  { %s822_s16 = smov 0   ;;  %s824_s17 = smov 0  }
   0xa LB: > { %s527_s18 = sadd.s32 4294967295, %s788_s17   ;;  %s528_s19 = sadd.s32 4294967294, %s788_s17   ;;  %s788_s17 = sphi %s824_s17, %s26_s17   ;;  %s784_s16 = sphi %s822_s16, %s1035_s16   ;;  %s780_s15 = sphi %s820_s15, %s1034_s15   ;;  %s776_s14 = sphi %s818_s14, %s1033_s14   ;;  %s772_s13 = sphi %s816_s13, %s1032_s13   ;;  %s768_s12 = sphi %s814_s12, %s1031_s12  }
   0xb   : > { %s45_s20 = sadd.s32 1, %s784_s16  ;;  %s60_s21 = sadd.s32 1, %s776_s14 }
   0xc   : > { %p47_p0 = scmp.ge.s32.totalorder %s45_s20, 2  ;;  %p67_p1 = scmp.ne.s32.totalorder %s776_s14, %s772_s13 }
   0xd   : > { %p68_p2 = scmp.eq.s32.totalorder %s788_s17, 0  ;;  %p73_p3 = scmp.ne.s32.totalorder %s772_s13, %s768_s12 }
   0xe   : > { %s1037_s20 = smov (%p47_p0, %s45_s20), 0  ;;  %p74_p5 = scmp.eq.s32.totalorder %s527_s18, 0 }
   0xf   : > { %p855_p4 = por %p68_p2, %p67_p1  ;;  %s55_s23 = ssub.s32 %s784_s16, %s1037_s20 }
  0x10   : > { %p133_p6 = scmp.eq.s32.totalorder %s527_s18, 1  ;;  %p58_p7 = scmp.eq.s32.totalorder %s55_s23, 0 }
  0x11   : > { %p861_p8 = por %p74_p5, %p73_p3  ;;  %p139_p10 = scmp.eq.s32.totalorder %s528_s19, 1 }
  0x12   : > { %p865_p9 = por %p133_p6, %p67_p1  ;;  %p568_p13 = scmp.lt.s32.totalorder %s788_s17, 2 }
  0x13   : > { %s870_s26 = scalar_select %p58_p7, %s776_s14, %s60_s21  }
  0x14   : > { %p872_p11 = por %p139_p10, %p73_p3  ;;  %s879_s28 = sand.u32 1, %s776_s14  }
  0x15   : > { %s531_s29 = sshll.u32 %s879_s28, 3  ;;  %s532_s30 = sshll.u32 %s784_s16, 7 }
  0x16   : > { %s200_s6 = scalar_lea.hbm %s1020_s0, %s532_s30  ;;  %s191_s7 = scalar_lea.vmem [#allocation4], %s531_s29 }
  0x17   : > { %s202_s8 = sshll.u32 %s191_s7, 4  ;;  %p888_p0 = pnand %p568_p13, %p855_p4  ;;  %s203_s8 = int_to_ptr.vmem [resolvable:$true] %s202_s8 }
  0x18   : > { %p535_p1 = scmp.ge.s32.totalorder %s788_s17, 1  ;;  %p229_p2 = scmp.lt.s32.totalorder %s788_s17, 3 }
  0x19   : > { %s188_s10 = scalar_lea.sflag [#allocation5], %s879_s28  ;;  %p620_p3 = pneg %p888_p0 }
  0x1a   : > { %s631_s11 = scalar_lea.vmem %s203_s8, 128  ;;  %s790_s18 = smov [#allocation4]  }
  0x1b   : > { %p632_p5 = scmp.ne.s32.totalorder %s203_s8, %s631_s11  ;;  %s636_s19 = sshll.u32 %s790_s18, 4  ;;  %s637_s19 = int_to_ptr.vmem [resolvable:$false] %s636_s19 }
  0x1c   : > { %s638_s21 = scalar_lea.vmem %s637_s19, 256  ;;  %p639_p4 = scmp.lt.s32.totalorder %s203_s8, %s637_s19 }
  0x1d   : > { %p634_p6 = pnand %p632_p5, %p620_p3  ;;  %p640_p10 = scmp.lt.s32.totalorder %s638_s21, %s631_s11 }
  0x1f   : > { %p635_p7 = pneg %p634_p6  ;;  %p641_p13 = por %p640_p10, %p639_p4 }
  0x21   : > { %p642_p12 = pnand %p641_p13, %p635_p7 }
  0x23   : > { %645 = shalt.err (!%p642_p12)
}
  0x24   : > { %557 = dma.hbm_to_vmem [thread:$0]  (!%p888_p0), %s200_s6, 128, %s203_s8, %s188_s10  }
  0x25   : > { %p906_p5 = pnand %p535_p1, %p229_p2  ;;  %s222_s5 = scalar_lea.hbm %s1021_s1, %s532_s30 }
  0x26   : > { %s213_s7 = scalar_lea.vmem [#allocation7], %s531_s29  ;;  %s210_s18 = scalar_lea.sflag [#allocation8], %s879_s28 }
  0x27   : > { %s224_s11 = sshll.u32 %s213_s7, 4  ;;  %s791_s6 = smov [#allocation7]   ;;  %s225_s11 = int_to_ptr.vmem [resolvable:$true] %s224_s11 }
  0x28   : > { %s659_s19 = scalar_lea.vmem %s225_s11, 128  ;;  %s664_s8 = sshll.u32 %s791_s6, 4  ;;  %s665_s8 = int_to_ptr.vmem [resolvable:$false] %s664_s8 }
  0x29   : > { %p660_p12 = scmp.ne.s32.totalorder %s225_s11, %s659_s19  ;;  %s666_s10 = scalar_lea.vmem %s665_s8, 256 }
  0x2a   : > { %p667_p1 = scmp.lt.s32.totalorder %s225_s11, %s665_s8  ;;  %p668_p2 = scmp.lt.s32.totalorder %s666_s10, %s659_s19 }
  0x2b   : > { %p662_p6 = pnand %p660_p12, %p620_p3 }
  0x2c   : > { %p669_p4 = por %p668_p2, %p667_p1 }
  0x2d   : > { %p663_p7 = pneg %p662_p6 }
  0x2f   : > { %p670_p10 = pnand %p669_p4, %p663_p7 }
  0x31   : > { %673 = shalt.err (!%p670_p10)
}
  0x32   : > { %560 = dma.hbm_to_vmem [thread:$0]  (!%p888_p0), %s222_s5, 128, %s225_s11, %s210_s18  }
  0x33   : > { %233 = sbr.rel (%p906_p5) target bundleno = 247 (0xf7), region = 28  ;;  %s922_s28 = sand.u32 (!%p906_p5), 1, %s772_s13  }
  0x34   : > { %s925_s29 = sshll.u32 (!%p906_p5), %s922_s28, 3  ;;  %s236_s30 = scalar_lea.sflag (!%p906_p5), [#allocation5], %s922_s28 }
  0x35   : > { %s239_s21 = scalar_lea.vmem (!%p906_p5), [#allocation4], %s925_s29 }
  0x38   : > { %751 = dma.done.wait (%p861_p8), %s236_s30, 128  }
  0x39   : > { %753 = vsyncadd (%p861_p8), %s236_s30, 4294967168  ;;  %s245_s9 = scalar_lea.sflag [#allocation8], %s922_s28  ;;  %s248_s22 = scalar_lea.vmem [#allocation7], %s925_s29 }
  0x3a   : > { %755 = dma.done.wait (%p861_p8), %s245_s9, 128  }
  0x3b   : > { %757 = vsyncadd (%p861_p8), %s245_s9, 4294967168  ;;  %v302_v0 = vld [vmem:[%s239_s21] sm:$0xff]  ;;  %v303_v1 = vld [vmem:[%s248_s22] sm:$0xff]  ;;  %s542_s24 = sshll.u32 %s780_s15, 7  ;;  %s273_s23 = scalar_lea.vmem [#allocation9], %s925_s29 }
  0x3c   : > { %v304_v2 = vmul.f32 %v303_v1, %v302_v0  ;;  %v306_v3 = vadd.f32 %v303_v1, %v302_v0  ;;  %s373_s4 = sshll.u32 %s273_s23, 4  ;;  %s946_s11 = scalar_lea.hbm %s1022_s2, %s542_s24  ;;  %s948_s4 = int_to_ptr.vmem [resolvable:$true] %s373_s4 }
  0x3d   : > { %s280_s18 = scalar_lea.vmem [#allocation10], %s925_s29  ;;  %s354_s6 = scalar_lea.sflag [#allocation6], %s922_s28 }
  0x3e   : > { %334 = vadd.xlane.f32.xlu0 %v304_v2  ;;  %s953_s19 = sshll.u32 %s280_s18, 4  ;;  %s674_s8 = scalar_lea.vmem %s948_s4, 128  ;;  %s388_s19 = int_to_ptr.vmem [resolvable:$true] %s953_s19 }
  0x3f   : > { %p675_p8 = scmp.ne.s32.totalorder %s948_s4, %s674_s8  ;;  %s792_s10 = smov [#allocation9]  }
  0x40   : > { %s678_s30 = sshll.u32 %s792_s10, 4  ;;  %s679_s30 = int_to_ptr.vmem [resolvable:$false] %s678_s30 }
  0x41   : > { %p676_p0 = pnand %p675_p8, %p865_p9  ;;  %s680_s21 = scalar_lea.vmem %s679_s30, 256 }
  0x42   : > { %343 = vadd.xlane.f32.xlu0 %v306_v3  ;;  %p681_p13 = scmp.lt.s32.totalorder %s948_s4, %s679_s30  ;;  %p682_p5 = scmp.lt.s32.totalorder %s680_s21, %s674_s8 }
  0x43   : > { %p677_p3 = pneg %p676_p0 }
  0x44   : > { %p683_p12 = por %p682_p5, %p681_p13 }
  0x46   : > { %p684_p6 = pnand %p683_p12, %p677_p3 }
  0xc7   : > { %v335_v4 = vpop.xlane.xlu0 %334 }
  0xc8   : > { %v336_v5 = vrot.slane %v335_v4, 4 }
  0xca   : > { %v337_v6 = vadd.f32 %v336_v5, %v335_v4 }
  0xcb   : > { %v344_v7 = vpop.xlane.xlu0 %343 }
  0xcc   : > { %v338_v8 = vrot.slane %v337_v6, 2  ;;  %v345_v9 = vrot.slane %v344_v7, 4 }
  0xce   : > { %v339_v10 = vadd.f32 %v338_v8, %v337_v6  ;;  %v346_v11 = vadd.f32 %v345_v9, %v344_v7 }
  0xd0   : > { %v340_v12 = vrot.slane %v339_v10, 1  ;;  %v347_v13 = vrot.slane %v346_v11, 2 }
  0xd2   : > { %v341_v14 = vadd.f32 %v340_v12, %v339_v10  ;;  %v348_v15 = vadd.f32 %v347_v13, %v346_v11 }
  0xd4   : > { %v349_v16 = vrot.slane %v348_v15, 1  ;;  %351 = vst [vmem:[%s273_s23] sm:$0xff] %v341_v14 }
  0xd5   : > { %687 = shalt.err (!%p684_p6)
}
  0xd6   : > { %s688_s9 = scalar_lea.hbm %s946_s11, 128  ;;  %s692_s5 = scalar_lea.hbm %s1022_s2, 256 }
  0xd7   : > { %p689_p7 = scmp.ne.s32.totalorder %s946_s11, %s688_s9  ;;  %p693_p4 = scmp.lt.s32.totalorder %s946_s11, %s1022_s2 }
  0xd8   : > { %p694_p10 = scmp.lt.s32.totalorder %s692_s5, %s688_s9 }
  0xd9   : > { %p690_p1 = pnand %p689_p7, %p865_p9 }
  0xda   : > { %p695_p8 = por %p694_p10, %p693_p4 }
  0xdb   : > { %p691_p2 = pneg %p690_p1 }
  0xdd   : > { %p696_p0 = pnand %p695_p8, %p691_p2 }
  0xdf   : > { %699 = shalt.err (!%p696_p0)
}
  0xe0   : > { %550 = dma.vmem_to_hbm [thread:$0]  (%p865_p9), %s948_s4, 128, %s946_s11, %s354_s6   ;;  %v350_v17 = vadd.f32 %v349_v16, %v348_v15 }
  0xe1   : > { %s385_s21 = scalar_lea.hbm %s1023_s3, %s542_s24  ;;  %s359_s9 = scalar_lea.sflag [#allocation11], %s922_s28 }
  0xe2   : > { %352 = vst [vmem:[%s280_s18] sm:$0xff] %v350_v17  ;;  %s700_s22 = scalar_lea.vmem %s388_s19, 128  ;;  %s793_s23 = smov [#allocation10]  }
  0xe3   : > { %p701_p3 = scmp.ne.s32.totalorder %s388_s19, %s700_s22  ;;  %s704_s5 = sshll.u32 %s793_s23, 4  ;;  %s705_s5 = int_to_ptr.vmem [resolvable:$false] %s704_s5 }
  0xe4   : > { %s706_s7 = scalar_lea.vmem %s705_s5, 256  ;;  %p707_p12 = scmp.lt.s32.totalorder %s388_s19, %s705_s5 }
  0xe5   : > { %p702_p13 = pnand %p701_p3, %p865_p9  ;;  %p708_p6 = scmp.lt.s32.totalorder %s706_s7, %s700_s22 }
  0xe7   : > { %p703_p5 = pneg %p702_p13  ;;  %p709_p7 = por %p708_p6, %p707_p12 }
  0xe9   : > { %p710_p1 = pnand %p709_p7, %p703_p5 }
  0xeb   : > { %713 = shalt.err (!%p710_p1)
}
  0xec   : > { %s714_s15 = scalar_lea.hbm %s385_s21, 128  ;;  %s718_s24 = scalar_lea.hbm %s1023_s3, 256 }
  0xed   : > { %p715_p2 = scmp.ne.s32.totalorder %s385_s21, %s714_s15  ;;  %p719_p8 = scmp.lt.s32.totalorder %s385_s21, %s1023_s3 }
  0xee   : > { %p720_p0 = scmp.lt.s32.totalorder %s718_s24, %s714_s15 }
  0xef   : > { %p716_p4 = pnand %p715_p2, %p865_p9 }
  0xf0   : > { %p721_p3 = por %p720_p0, %p719_p8 }
  0xf1   : > { %p717_p10 = pneg %p716_p4 }
  0xf3   : > { %p722_p13 = pnand %p721_p3, %p717_p10 }
  0xf5   : > { %725 = shalt.err (!%p722_p13)
}
  0xf6   : > { %551 = dma.vmem_to_hbm [thread:$0]  (%p865_p9), %s388_s19, 128, %s385_s21, %s359_s9  }
  0xf7 PF: > { %s399_s18 = sand.u32 1, %s768_s12   ;;  %p1030_p5 = scmp.ge.s32.totalorder %s788_s17, 2 }
  0xf8   : > { %s400_s6 = scalar_lea.sflag [#allocation6], %s399_s18 }
  0xf9   : > { %p562_p12 = pnand %p1030_p5, %p872_p11 }
  0xfb   : > { %p563_p6 = pneg %p562_p12 }
  0xfd   : > { %759 = dma.done.wait (%p563_p6), %s400_s6, 128  }
  0xfe   : > { %761 = vsyncadd (%p563_p6), %s400_s6, 4294967168  ;;  %s409_s10 = scalar_lea.sflag [#allocation11], %s399_s18 }
  0xff   : > { %763 = dma.done.wait (%p563_p6), %s409_s10, 128  }
 0x100   : > { %765 = vsyncadd (%p563_p6), %s409_s10, 4294967168  ;;  %s26_s17 = sadd.s32 1, %s788_s17   ;;  %s1031_s12 = smov %s772_s13 }
 0x101   : > { %p23_p7 = scmp.ge.s32.totalorder %s26_s17, 4   ;;  %s1032_s13 = smov %s776_s14 }
 0x102   : > { %s1033_s14 = smov %s870_s26  ;;  %s1034_s15 = smov %s784_s16 }
 0x103   : > { %s1035_s16 = smov %s1037_s20  ;;  %25 = sbr.rel (!%p23_p7) target bundleno = 10 (0xa), region = 119 }
 0x108   :  { %414 = vsyncpa [#allocation5], 1 }
 0x109   :  { %416 = vsyncpa [#allocation5 + $0x1], 1 }
 0x10a   :  { %417 = vsyncpa [#allocation8], 1 }
 0x10b   :  { %419 = vsyncpa [#allocation8 + $0x1], 1 }
 0x10c   :  { %420 = vsyncpa [#allocation6], 1 }
 0x10d   :  { %422 = vsyncpa [#allocation6 + $0x1], 1 }
 0x10e   :  { %423 = vsyncpa [#allocation11], 1 }
 0x10f   :  { %425 = vsyncpa [#allocation11 + $0x1], 1 }

</bundles_post_ra>
